<compile_context>
chip_gen: v6e
topology: v6e:2x2x1
jax: 0.10.0
libtpu: 0.0.40
codegen_flags: <defaults>
</compile_context>

<pallas_src>
import functools

import jax
import jax.numpy as jnp
from jax.experimental import pallas as pl
from jax.experimental.pallas import tpu as pltpu

_LANE = 128          # lane width: final (tiny) action dim is padded to this
_MAX_TB = 256        # batch-tile cap: amortizes per-step overhead, matches
                     # the v6e/v7x 256-row MXU, and keeps >=2 grid steps for
                     # batches > 256 so both v7x TensorCores are fed.


def _policy_mlp_kernel(x_ref, w1_ref, b1_ref, w2_ref, b2_ref, w3_ref, b3_ref,
                       o_ref):
    """Fused 3-layer MLP over one batch tile; weights resident across tiles."""
    x = x_ref[...]                                                  # (TB, S) bf16
    h1 = jnp.dot(x, w1_ref[...], preferred_element_type=jnp.float32)
    h1 = jnp.maximum(h1 + b1_ref[...], 0.0)                         # f32 ReLU
    h1 = h1.astype(jnp.bfloat16)
    h2 = jnp.dot(h1, w2_ref[...], preferred_element_type=jnp.float32)
    h2 = jnp.maximum(h2 + b2_ref[...], 0.0)                         # f32 ReLU
    h2 = h2.astype(jnp.bfloat16)
    out = jnp.dot(h2, w3_ref[...], preferred_element_type=jnp.float32)
    # f32 tanh (EUP), bf16 store -> halves the padded-output HBM write.
    o_ref[...] = jnp.tanh(out + b3_ref[...]).astype(jnp.bfloat16)


def _round_up(x, m):
    return ((x + m - 1) // m) * m


@functools.partial(jax.jit, static_argnames=("action_size",))
def policy_network_forward(state, w1, b1, w2, b2, w3p, b3p, *, action_size):
    """state: (batch, state_size) f32.  w3p/b3p are already lane-padded to 128.

    Returns (batch, action_size) f32.
    """
    batch, state_size = state.shape
    h2_dim, pad_n = w3p.shape

    # Batch tile: multiple of 16 sublanes (bf16 packing), capped at _MAX_TB.
    rb = _round_up(batch, 16)
    tb = rb if rb <= _MAX_TB else _MAX_TB
    padded_batch = _round_up(batch, tb)

    x = state.astype(jnp.bfloat16)
    if padded_batch != batch:
        x = jnp.pad(x, ((0, padded_batch - batch), (0, 0)))

    grid = (padded_batch // tb,)

    # Resident (constant index_map) weight / bias blocks.
    resident = lambda shape: pl.BlockSpec(shape, lambda i: (0, 0))

    out_padded = pl.pallas_call(
        _policy_mlp_kernel,
        out_shape=jax.ShapeDtypeStruct((padded_batch, pad_n), jnp.bfloat16),
        grid=grid,
        in_specs=[
            pl.BlockSpec((tb, state_size), lambda i: (i, 0)),   # batch-tiled
            resident(w1.shape), resident(b1.shape),
            resident(w2.shape), resident(b2.shape),
            resident(w3p.shape), resident(b3p.shape),
        ],
        out_specs=pl.BlockSpec((tb, pad_n), lambda i: (i, 0)),
        compiler_params=pltpu.CompilerParams(
            dimension_semantics=("parallel",),
            vmem_limit_bytes=32 << 20,
        ),
    )(x, w1, b1, w2, b2, w3p, b3p)

    return out_padded[:batch, :action_size].astype(jnp.float32)


def init_policy_params(key, state_size, action_size,
                       hidden_layer_sizes=(512, 256)):
    """Deterministic parameter init mirroring Policy_network.reset_parameters.

    NOTE: the original `hidden_init` uses weight.size()[0] which in PyTorch is
    out_features (weight is [out, in]); we replicate that bound choice.

    Layout plumbing is done here, once, not per forward call:
      * weights stored (in, out), cast to bf16 (MXU-native, halves weight DMA)
      * w3/b3 lane-padded to 128 output columns so the final matmul and the
        output stores are unmasked; biases stay f32 (and padded bias is 0, so
        padded columns compute tanh(0)=0 and are sliced off).
    """
    h1, h2 = hidden_layer_sizes
    k = jax.random.split(key, 6)

    lim1 = 1.0 / jnp.sqrt(jnp.float32(h1))
    lim2 = 1.0 / jnp.sqrt(jnp.float32(h2))
    lim3 = 0.003

    # Weights stored (in, out) for x @ W.
    w1 = jax.random.uniform(k[0], (state_size, h1), jnp.float32, -lim1, lim1)
    w2 = jax.random.uniform(k[1], (h1, h2), jnp.float32, -lim2, lim2)
    w3 = jax.random.uniform(k[2], (h2, action_size), jnp.float32, -lim3, lim3)

    # Biases: PyTorch default Linear bias init uniform(-1/sqrt(fan_in), ...)
    bl1 = 1.0 / jnp.sqrt(jnp.float32(state_size))
    bl2 = 1.0 / jnp.sqrt(jnp.float32(h1))
    bl3 = 1.0 / jnp.sqrt(jnp.float32(h2))
    b1 = jax.random.uniform(k[3], (1, h1), jnp.float32, -bl1, bl1)
    b2 = jax.random.uniform(k[4], (1, h2), jnp.float32, -bl2, bl2)
    b3 = jax.random.uniform(k[5], (1, action_size), jnp.float32, -bl3, bl3)

    # ---- hoisted layout work: bf16 weights + lane-padded output layer ----
    pad_n = _round_up(action_size, _LANE)
    w3p = jnp.pad(w3, ((0, 0), (0, pad_n - action_size)))
    b3p = jnp.pad(b3, ((0, 0), (0, pad_n - action_size)))

    w1, w2, w3p = (w.astype(jnp.bfloat16) for w in (w1, w2, w3p))

    return w1, b1, w2, b2, w3p, b3p


def _reference_forward(state, w1, b1, w2, b2, w3p, b3p, action_size):
    """Pure-JAX reference with the same bf16-operand / f32-accumulate path."""
    x = state.astype(jnp.bfloat16)
    h1 = jnp.maximum(
        jnp.dot(x, w1, preferred_element_type=jnp.float32) + b1, 0.0)
    h1 = h1.astype(jnp.bfloat16)
    h2 = jnp.maximum(
        jnp.dot(h1, w2, preferred_element_type=jnp.float32) + b2, 0.0)
    h2 = h2.astype(jnp.bfloat16)
    out = jnp.tanh(jnp.dot(h2, w3p, preferred_element_type=jnp.float32) + b3p)
    return out[:, :action_size]


if __name__ == "__main__":
    key = jax.random.PRNGKey(0)
    k_state, k_params = jax.random.split(key)

    batch = 8
    state_size = 32
    action_size = 4
    hidden_layer_sizes = (512, 256)

    state = jax.random.normal(k_state, (batch, state_size), jnp.float32)
    params = init_policy_params(k_params, state_size, action_size,
                                hidden_layer_sizes)

    out = policy_network_forward(state, *params, action_size=action_size)
    out = jax.block_until_ready(out)

    ref = _reference_forward(state, *params, action_size)
    assert out.shape == (batch, action_size)
    assert jnp.allclose(out, ref, atol=1e-2, rtol=1e-2), (
        float(jnp.max(jnp.abs(out - ref))))

    print("KERNEL_OK")
</pallas_src>

<mosaic_0001>
module attributes {stable_mosaic.version = 11 : i64} {
  func.func @_policy_mlp_kernel(%arg0: i32, %arg1: memref<16x32xbf16, #tpu.memory_space<vmem>>, %arg2: memref<32x512xbf16, #tpu.memory_space<vmem>>, %arg3: memref<1x512xf32, #tpu.memory_space<vmem>>, %arg4: memref<512x256xbf16, #tpu.memory_space<vmem>>, %arg5: memref<1x256xf32, #tpu.memory_space<vmem>>, %arg6: memref<256x128xbf16, #tpu.memory_space<vmem>>, %arg7: memref<1x128xf32, #tpu.memory_space<vmem>>, %arg8: memref<16x128xbf16, #tpu.memory_space<vmem>>) attributes {dimension_semantics = [#tpu.dimension_semantics<parallel>], iteration_bounds = array<i64: 1>, scalar_prefetch = 0 : i64, scratch_operands = 0 : i64, tpu.core_type = #tpu.core_type<tc>, window_params = [{transform_indices = @transform_0, window_bounds = array<i64: 16, 32>}, {pipeline_mode = #tpu.pipeline_mode<synchronous>, transform_indices = @transform_1, window_bounds = array<i64: 32, 512>}, {pipeline_mode = #tpu.pipeline_mode<synchronous>, transform_indices = @transform_2, window_bounds = array<i64: 1, 512>}, {pipeline_mode = #tpu.pipeline_mode<synchronous>, transform_indices = @transform_3, window_bounds = array<i64: 512, 256>}, {pipeline_mode = #tpu.pipeline_mode<synchronous>, transform_indices = @transform_4, window_bounds = array<i64: 1, 256>}, {pipeline_mode = #tpu.pipeline_mode<synchronous>, transform_indices = @transform_5, window_bounds = array<i64: 256, 128>}, {pipeline_mode = #tpu.pipeline_mode<synchronous>, transform_indices = @transform_6, window_bounds = array<i64: 1, 128>}, {transform_indices = @transform_7, window_bounds = array<i64: 16, 128>}]} {
    %c0 = arith.constant 0 : index
    %c0_0 = arith.constant 0 : index
    %0 = vector.load %arg1[%c0, %c0_0] : memref<16x32xbf16, #tpu.memory_space<vmem>>, vector<16x32xbf16>
    %c0_1 = arith.constant 0 : index
    %c0_2 = arith.constant 0 : index
    %1 = vector.load %arg2[%c0_1, %c0_2] : memref<32x512xbf16, #tpu.memory_space<vmem>>, vector<32x512xbf16>
    %cst = arith.constant dense<0.000000e+00> : vector<16x512xf32>
    %2 = tpu.matmul %0, %1, %cst {dimension_numbers = #tpu.dot_dimension_numbers<[1], [0], [0], [1], [0, 0, 1, 1], [], []>} : vector<16x32xbf16>, vector<32x512xbf16>, vector<16x512xf32> -> vector<16x512xf32>
    %c0_3 = arith.constant 0 : index
    %c0_4 = arith.constant 0 : index
    %3 = vector.load %arg3[%c0_3, %c0_4] : memref<1x512xf32, #tpu.memory_space<vmem>>, vector<1x512xf32>
    %4 = vector.broadcast %3 : vector<1x512xf32> to vector<16x512xf32>
    %5 = arith.addf %2, %4 : vector<16x512xf32>
    %cst_5 = arith.constant 0.000000e+00 : f32
    %6 = vector.broadcast %cst_5 : f32 to vector<16x512xf32>
    %7 = arith.maximumf %5, %6 : vector<16x512xf32>
    %8 = arith.truncf %7 : vector<16x512xf32> to vector<16x512xbf16>
    %c0_6 = arith.constant 0 : index
    %c0_7 = arith.constant 0 : index
    %9 = vector.load %arg4[%c0_6, %c0_7] : memref<512x256xbf16, #tpu.memory_space<vmem>>, vector<512x256xbf16>
    %cst_8 = arith.constant dense<0.000000e+00> : vector<16x256xf32>
    %10 = tpu.matmul %8, %9, %cst_8 {dimension_numbers = #tpu.dot_dimension_numbers<[1], [0], [0], [1], [0, 0, 1, 1], [], []>} : vector<16x512xbf16>, vector<512x256xbf16>, vector<16x256xf32> -> vector<16x256xf32>
    %c0_9 = arith.constant 0 : index
    %c0_10 = arith.constant 0 : index
    %11 = vector.load %arg5[%c0_9, %c0_10] : memref<1x256xf32, #tpu.memory_space<vmem>>, vector<1x256xf32>
    %12 = vector.broadcast %11 : vector<1x256xf32> to vector<16x256xf32>
    %13 = arith.addf %10, %12 : vector<16x256xf32>
    %cst_11 = arith.constant 0.000000e+00 : f32
    %14 = vector.broadcast %cst_11 : f32 to vector<16x256xf32>
    %15 = arith.maximumf %13, %14 : vector<16x256xf32>
    %16 = arith.truncf %15 : vector<16x256xf32> to vector<16x256xbf16>
    %c0_12 = arith.constant 0 : index
    %c0_13 = arith.constant 0 : index
    %17 = vector.load %arg6[%c0_12, %c0_13] : memref<256x128xbf16, #tpu.memory_space<vmem>>, vector<256x128xbf16>
    %cst_14 = arith.constant dense<0.000000e+00> : vector<16x128xf32>
    %18 = tpu.matmul %16, %17, %cst_14 {dimension_numbers = #tpu.dot_dimension_numbers<[1], [0], [0], [1], [0, 0, 1, 1], [], []>} : vector<16x256xbf16>, vector<256x128xbf16>, vector<16x128xf32> -> vector<16x128xf32>
    %c0_15 = arith.constant 0 : index
    %c0_16 = arith.constant 0 : index
    %19 = vector.load %arg7[%c0_15, %c0_16] : memref<1x128xf32, #tpu.memory_space<vmem>>, vector<1x128xf32>
    %20 = vector.broadcast %19 : vector<1x128xf32> to vector<16x128xf32>
    %21 = arith.addf %18, %20 : vector<16x128xf32>
    %22 = math.tanh %21 : vector<16x128xf32>
    %23 = arith.truncf %22 : vector<16x128xf32> to vector<16x128xbf16>
    %c0_17 = arith.constant 0 : index
    %c0_18 = arith.constant 0 : index
    %24 = vector.load %arg8[%c0_17, %c0_18] : memref<16x128xbf16, #tpu.memory_space<vmem>>, vector<16x128xbf16>
    tpu.vector_store %arg8[%c0_17, %c0_18], %23 {strides = array<i32>} : memref<16x128xbf16, #tpu.memory_space<vmem>>, vector<16x128xbf16>,
    return
  }
  func.func @transform_0(%arg0: i32) -> (i32, i32) {
    %c0_i32 = arith.constant 0 : i32
    %c0_i32_0 = arith.constant 0 : i32
    return %arg0, %c0_i32 : i32, i32
  }
  func.func @transform_1(%arg0: i32) -> (i32, i32) {
    %c0_i32 = arith.constant 0 : i32
    %c0_i32_0 = arith.constant 0 : i32
    %c0_i32_1 = arith.constant 0 : i32
    return %c0_i32, %c0_i32_0 : i32, i32
  }
  func.func @transform_2(%arg0: i32) -> (i32, i32) {
    %c0_i32 = arith.constant 0 : i32
    %c0_i32_0 = arith.constant 0 : i32
    %c0_i32_1 = arith.constant 0 : i32
    return %c0_i32, %c0_i32_0 : i32, i32
  }
  func.func @transform_3(%arg0: i32) -> (i32, i32) {
    %c0_i32 = arith.constant 0 : i32
    %c0_i32_0 = arith.constant 0 : i32
    %c0_i32_1 = arith.constant 0 : i32
    return %c0_i32, %c0_i32_0 : i32, i32
  }
  func.func @transform_4(%arg0: i32) -> (i32, i32) {
    %c0_i32 = arith.constant 0 : i32
    %c0_i32_0 = arith.constant 0 : i32
    %c0_i32_1 = arith.constant 0 : i32
    return %c0_i32, %c0_i32_0 : i32, i32
  }
  func.func @transform_5(%arg0: i32) -> (i32, i32) {
    %c0_i32 = arith.constant 0 : i32
    %c0_i32_0 = arith.constant 0 : i32
    %c0_i32_1 = arith.constant 0 : i32
    return %c0_i32, %c0_i32_0 : i32, i32
  }
  func.func @transform_6(%arg0: i32) -> (i32, i32) {
    %c0_i32 = arith.constant 0 : i32
    %c0_i32_0 = arith.constant 0 : i32
    %c0_i32_1 = arith.constant 0 : i32
    return %c0_i32, %c0_i32_0 : i32, i32
  }
  func.func @transform_7(%arg0: i32) -> (i32, i32) {
    %c0_i32 = arith.constant 0 : i32
    %c0_i32_0 = arith.constant 0 : i32
    return %arg0, %c0_i32 : i32, i32
  }
}

</mosaic_0001>

<bundles_post_ra>
// kernel: policy_network_forward.1
= control target key start
LH: loop header
LB: loop body
LE: loop exit
PB: predicated region body
PF: predicated region fallthrough
CT: control target
= control target key end

     0   :  { %12 = vsyncpa [#allocation3], 0  ;;  %s1345_s0 = inlined_call_operand.vmem [shape: bf16[16,32], index: 0, kind: input, shape index: {}]   ;;  %s1346_s1 = inlined_call_operand.hbm [shape: bf16[32,512], index: 1, kind: input, shape index: {}]   ;;  %s1347_s2 = inlined_call_operand.vmem [shape: f32[1,512], index: 2, kind: input, shape index: {}]   ;;  %s1348_s3 = inlined_call_operand.hbm [shape: bf16[512,256], index: 3, kind: input, shape index: {}]   ;;  %s1349_s4 = inlined_call_operand.vmem [shape: f32[1,256], index: 4, kind: input, shape index: {}]   ;;  %s1350_s5 = inlined_call_operand.hbm [shape: bf16[256,128], index: 5, kind: input, shape index: {}]   ;;  %s1351_s6 = inlined_call_operand.vmem [shape: f32[1,128], index: 6, kind: input, shape index: {}]   ;;  %s1352_s7 = inlined_call_operand.vmem [shape: bf16[16,128], index: 7, kind: output, shape index: {}]  }
   0x1   :  { %13 = vsyncpa [#allocation5], 0  ;;  %s1255_s24 = smov [#allocation4]  }
   0x2   :  { %s35_s25 = sshll.u32 %s1255_s24, 4  ;;  %s36_s25 = int_to_ptr.vmem [resolvable:$true] %s35_s25 }
   0x3   :  { %s1199_s26 = scalar_lea.vmem %s36_s25, 8192  ;;  %p1204_p1 = scmp.lt.s32.totalorder %s36_s25, %s36_s25 }
   0x4   :  { %p1200_p0 = scmp.ne.s32.totalorder %s36_s25, %s1199_s26  ;;  %p1205_p2 = scmp.lt.s32.totalorder %s1199_s26, %s1199_s26 }
   0x6   :  { %p1206_p3 = por %p1205_p2, %p1204_p1 }
   0x8   :  { %p1207_p4 = pnand %p1206_p3, %p1200_p0 }
   0xa   :  { %1210 = shalt.err (!%p1207_p4)
}
   0xb   :  { %s1256_s27 = smov 128   ;;  %s1257_s28 = smov 8  }
   0xc   :  { %41 = dma.hbm_to_vmem [thread:$0]  %s1348_s3, 8192, %s36_s25, [#allocation5], %s1256_s27, %s1256_s27, %s1257_s28  }
   0xd   :  { %s1258_s8 = smov [#allocation2]  }
   0xe   :  { %s21_s9 = sshll.u32 %s1258_s8, 4  ;;  %s22_s9 = int_to_ptr.vmem [resolvable:$true] %s21_s9 }
   0xf   :  { %s1219_s10 = scalar_lea.vmem %s22_s9, 1024  ;;  %p1224_p6 = scmp.lt.s32.totalorder %s22_s9, %s22_s9 }
  0x10   :  { %p1220_p5 = scmp.ne.s32.totalorder %s22_s9, %s1219_s10  ;;  %p1225_p7 = scmp.lt.s32.totalorder %s1219_s10, %s1219_s10 }
  0x12   :  { %p1226_p8 = por %p1225_p7, %p1224_p6 }
  0x14   :  { %p1227_p9 = pnand %p1226_p8, %p1220_p5 }
  0x16   :  { %1230 = shalt.err (!%p1227_p9)
}
  0x17   :  { %s1259_s11 = smov 256   ;;  %s1260_s12 = smov 16  }
  0x18   :  { %27 = dma.hbm_to_vmem [thread:$0]  %s1346_s1, 1024, %s22_s9, [#allocation3], %s1259_s11, %s1259_s11, %s1260_s12  }
  0x19   :  { %s1261_s15 = smov [#allocation6]  }
  0x1a   :  { %s49_s16 = sshll.u32 %s1261_s15, 4  ;;  %s50_s16 = int_to_ptr.vmem [resolvable:$true] %s49_s16 }
  0x1b   :  { %s1239_s3 = scalar_lea.vmem %s50_s16, 2048  ;;  %p1244_p11 = scmp.lt.s32.totalorder %s50_s16, %s50_s16 }
  0x1c   :  { %p1240_p10 = scmp.ne.s32.totalorder %s50_s16, %s1239_s3  ;;  %p1245_p12 = scmp.lt.s32.totalorder %s1239_s3, %s1239_s3 }
  0x1e   :  { %p1246_p13 = por %p1245_p12, %p1244_p11 }
  0x20   :  { %p1247_p0 = pnand %p1246_p13, %p1240_p10 }
  0x22   :  { %1250 = shalt.err (!%p1247_p0)
}
  0x23   :  { %s1262_s17 = smov 64   ;;  %s1263_s18 = smov 4  }
  0x24   :  { %55 = dma.hbm_to_vmem [thread:$0]  %s1350_s5, 2048, %s50_s16, [#allocation5], %s1262_s17, %s1262_s17, %s1263_s18  }
  0x25   :  { %1251 = dma.done.wait [#allocation3], 1024  }
  0x26   :  { %1252 = vsyncadd [#allocation3], 4294966272 }
  0x27   :  { %1253 = dma.done.wait [#allocation5], 10240  }
  0x28   :  { %1254 = vsyncadd [#allocation5], 4294957056  ;;  %v1264_v0 = vmov 0   ;;  %v1062_v1 = vld [vmem:[#allocation2 + $0x24] ss:$16 sps:$4 sm:$0xff]   ;;  %vm145_vm0 = vcmask 261120  }
  0x29   :  { %181 = vmatprep.mubr.bf16.mxu1 %v1264_v0  ;;  %v1064_v2 = vld [vmem:[#allocation2 + $0x20] ss:$16 sps:$4 sm:$0xff]   ;;  %161 = vmatprep.subr.bf16.mxu1 %v1062_v1  ;;  %v1065_v3 = vld [vmem:[#allocation2 + $0x4] ss:$16 sps:$4 sm:$0xff]   ;;  %v1071_v5 = vld [vmem:[#allocation2 + $0x2c] ss:$16 sps:$4 sm:$0xff]  }
  0x2a   :  { %162 = vmatpush1.bf16.msra.mxu1 %v1064_v2  ;;  %v1067_v4 = vld [vmem:[#allocation2] ss:$16 sps:$4 sm:$0xff]   ;;  %v1069_v7 = vld [vmem:[#allocation2 + $0x28] ss:$16 sps:$4 sm:$0xff]   ;;  %v1075_v8 = vld [vmem:[#allocation4 + $0x74] ss:$8 sps:$4 sm:$0xff]  }
  0x2b   :  { %163 = vmatprep.subr.bf16.mxu1 %v1065_v3  ;;  %v1068_v6 = vld [vmem:[%s1345_s0] sm:$0xff]   ;;  %v1077_v9 = vld [vmem:[#allocation4 + $0x70] ss:$8 sps:$4 sm:$0xff]   ;;  %v1074_v10 = vld [vmem:[#allocation2 + $0xc] ss:$16 sps:$4 sm:$0xff]   ;;  %643 = vmatprep.subr.bf16.mxu0 %v1075_v8 }
  0x2c   :  { %v1078_v11 = vld [vmem:[#allocation4 + $0x64] ss:$8 sps:$4 sm:$0xff]   ;;  %644 = vmatpush1.bf16.msra.mxu0 %v1077_v9  ;;  %v1080_v12 = vld [vmem:[#allocation4 + $0x60] ss:$8 sps:$4 sm:$0xff]   ;;  %v1081_v14 = vld [vmem:[#allocation4 + $0x54] ss:$8 sps:$4 sm:$0xff]  }
  0x2d   :  { %v1072_v13 = vld [vmem:[#allocation2 + $0x8] ss:$16 sps:$4 sm:$0xff]   ;;  %645 = vmatprep.subr.bf16.mxu0 %v1078_v11  ;;  %v1085_v15 = vld [vmem:[#allocation4 + $0x174] ss:$8 sps:$4 sm:$0xff]   ;;  %v1087_v18 = vld [vmem:[#allocation4 + $0x44] ss:$8 sps:$4 sm:$0xff]   ;;  %v80_v11 = vlaneseq }
  0x2e   :  { %164 = vmatpush1.bf16.msra.mxu1 %v1067_v4  ;;  %v1083_v16 = vld [vmem:[#allocation4 + $0x170] ss:$8 sps:$4 sm:$0xff]   ;;  %v1091_v19 = vld [vmem:[#allocation4 + $0x164] ss:$8 sps:$4 sm:$0xff]   ;;  %v1092_v20 = vld [vmem:[#allocation4 + $0x40] ss:$8 sps:$4 sm:$0xff]  }
  0x2f   :  { %204 = vmatprep.subr.bf16.mxu1 %v1071_v5  ;;  %v1086_v17 = vld [vmem:[#allocation4 + $0x50] ss:$8 sps:$4 sm:$0xff]   ;;  %v1089_v21 = vld [vmem:[#allocation4 + $0x160] ss:$8 sps:$4 sm:$0xff]   ;;  %v1093_v22 = vld [vmem:[#allocation4 + $0x34] ss:$8 sps:$4 sm:$0xff]  }
  0x30   :  { %646 = vmatpush1.bf16.msra.mxu0 %v1080_v12  ;;  %v1097_v23 = vld [vmem:[#allocation4 + $0x154] ss:$8 sps:$4 sm:$0xff]   ;;  %v1095_v24 = vld [vmem:[#allocation4 + $0x150] ss:$8 sps:$4 sm:$0xff]   ;;  %v1099_v26 = vld [vmem:[#allocation4 + $0x24] ss:$8 sps:$4 sm:$0xff]  }
  0x31   :  { %938 = vmatmul.mubr.msk.bf16.vlgmr.msra.gmra.mxu1 %vm145_vm0, %v1068_v6  ;;  %647 = vmatprep.subr.bf16.mxu0 %v1081_v14  ;;  %v1098_v25 = vld [vmem:[#allocation4 + $0x30] ss:$8 sps:$4 sm:$0xff]   ;;  %v1103_v27 = vld [vmem:[#allocation4 + $0x144] ss:$8 sps:$4 sm:$0xff]   ;;  %v1104_v28 = vld [vmem:[#allocation4 + $0x20] ss:$8 sps:$4 sm:$0xff]  }
  0x32   :  { %205 = vmatpush1.bf16.msra.mxu1 %v1069_v7  ;;  %224 = vmatprep.mubr.bf16.mxu1 %v1264_v0  ;;  %v1101_v29 = vld [vmem:[#allocation4 + $0x140] ss:$8 sps:$4 sm:$0xff]   ;;  %v1105_v30 = vld [vmem:[#allocation4 + $0x14] ss:$8 sps:$4 sm:$0xff]   ;;  %v1107_v32 = vld [vmem:[#allocation4 + $0x130] ss:$8 sps:$4 sm:$0xff]  }
  0x33   :  { %206 = vmatprep.subr.bf16.mxu1 %v1074_v10  ;;  %v1109_v31 = vld [vmem:[#allocation4 + $0x134] ss:$8 sps:$4 sm:$0xff]   ;;  %v1110_v33 = vld [vmem:[#allocation4 + $0x10] ss:$8 sps:$4 sm:$0xff]   ;;  %v1111_v34 = vld [vmem:[#allocation4 + $0x4] ss:$8 sps:$4 sm:$0xff]  }
  0x34   :  { %648 = vmatpush1.bf16.msra.mxu0 %v1086_v17  ;;  %v1115_v35 = vld [vmem:[#allocation4 + $0x124] ss:$8 sps:$4 sm:$0xff]   ;;  %v1116_v36 = vld [vmem:[#allocation4] ss:$8 sps:$4 sm:$0xff]   ;;  %v1117_v38 = vld [vmem:[#allocation4 + $0xf4] ss:$8 sps:$4 sm:$0xff]  }
  0x35   :  { %649 = vmatprep.subr.bf16.mxu0 %v1087_v18  ;;  %v1113_v37 = vld [vmem:[#allocation4 + $0x120] ss:$8 sps:$4 sm:$0xff]   ;;  %v1121_v39 = vld [vmem:[#allocation4 + $0x114] ss:$8 sps:$4 sm:$0xff]   ;;  %v1119_v40 = vld [vmem:[#allocation4 + $0x110] ss:$8 sps:$4 sm:$0xff]  }
  0x36   :  { %207 = vmatpush1.bf16.msra.mxu1 %v1072_v13  ;;  %v1122_v41 = vld [vmem:[#allocation4 + $0xf0] ss:$8 sps:$4 sm:$0xff]   ;;  %v1123_v42 = vld [vmem:[#allocation4 + $0xe4] ss:$8 sps:$4 sm:$0xff]   ;;  %v1128_v44 = vld [vmem:[#allocation4 + $0xe0] ss:$8 sps:$4 sm:$0xff]  }
  0x37   :  { %686 = vmatprep.subr.bf16.mxu1 %v1085_v15  ;;  %v1127_v43 = vld [vmem:[#allocation4 + $0x104] ss:$8 sps:$4 sm:$0xff]   ;;  %v1125_v45 = vld [vmem:[#allocation4 + $0x100] ss:$8 sps:$4 sm:$0xff]   ;;  %v1129_v46 = vld [vmem:[#allocation4 + $0xd4] ss:$8 sps:$4 sm:$0xff]  }
  0x38   :  { %650 = vmatpush1.bf16.msra.mxu0 %v1092_v20  ;;  %v1133_v47 = vld [vmem:[#allocation4 + $0x1f4] ss:$8 sps:$4 sm:$0xff]   ;;  %v1134_v48 = vld [vmem:[#allocation4 + $0xd0] ss:$8 sps:$4 sm:$0xff]   ;;  %v1135_v50 = vld [vmem:[#allocation4 + $0xc4] ss:$8 sps:$4 sm:$0xff]  }
  0x39   :  { %939 = vmatmul.mubr.msk.bf16.vlgmr.msra.gmra.mxu1 %vm145_vm0, %v1068_v6  ;;  %651 = vmatprep.subr.bf16.mxu0 %v1093_v22  ;;  %v1131_v49 = vld [vmem:[#allocation4 + $0x1f0] ss:$8 sps:$4 sm:$0xff]   ;;  %v1139_v51 = vld [vmem:[#allocation4 + $0x1e4] ss:$8 sps:$4 sm:$0xff]   ;;  %v1140_v52 = vld [vmem:[#allocation4 + $0xc0] ss:$8 sps:$4 sm:$0xff]  }
  0x3a   :  { %687 = vmatpush1.bf16.msra.mxu1 %v1083_v16  ;;  %v1137_v53 = vld [vmem:[#allocation4 + $0x1e0] ss:$8 sps:$4 sm:$0xff]   ;;  %v1141_v54 = vld [vmem:[#allocation4 + $0xb4] ss:$8 sps:$4 sm:$0xff]   ;;  %v1146_v56 = vld [vmem:[#allocation4 + $0xb0] ss:$8 sps:$4 sm:$0xff]  }
  0x3b   :  { %688 = vmatprep.subr.bf16.mxu1 %v1091_v19  ;;  %v1145_v55 = vld [vmem:[#allocation4 + $0x1d4] ss:$8 sps:$4 sm:$0xff]   ;;  %v1143_v57 = vld [vmem:[#allocation4 + $0x1d0] ss:$8 sps:$4 sm:$0xff]   ;;  %v1147_v58 = vld [vmem:[#allocation4 + $0xa4] ss:$8 sps:$4 sm:$0xff]  }
  0x3c   :  { %652 = vmatpush1.bf16.msra.mxu0 %v1098_v25  ;;  %v1151_v59 = vld [vmem:[#allocation4 + $0x1c4] ss:$8 sps:$4 sm:$0xff]   ;;  %v1149_v60 = vld [vmem:[#allocation4 + $0x1c0] ss:$8 sps:$4 sm:$0xff]   ;;  %v1153_v62 = vld [vmem:[#allocation4 + $0x94] ss:$8 sps:$4 sm:$0xff]  }
  0x3d   :  { %653 = vmatprep.subr.bf16.mxu0 %v1099_v26  ;;  %v1152_v61 = vld [vmem:[#allocation4 + $0xa0] ss:$8 sps:$4 sm:$0xff]   ;;  %v1157_v63 = vld [vmem:[#allocation4 + $0x1b4] ss:$8 sps:$4 sm:$0xff]   ;;  %v1155_v0 = vld [vmem:[#allocation4 + $0x1b0] ss:$8 sps:$4 sm:$0xff]  }
  0x3e   :  { %689 = vmatpush1.bf16.msra.mxu1 %v1089_v21  ;;  %v1158_v1 = vld [vmem:[#allocation4 + $0x90] ss:$8 sps:$4 sm:$0xff]   ;;  %v1159_v2 = vld [vmem:[#allocation4 + $0x84] ss:$8 sps:$4 sm:$0xff]   ;;  %v1161_v4 = vld [vmem:[#allocation4 + $0x1a0] ss:$8 sps:$4 sm:$0xff]  }
  0x3f   :  { %690 = vmatprep.subr.bf16.mxu1 %v1097_v23  ;;  %v1163_v3 = vld [vmem:[#allocation4 + $0x1a4] ss:$8 sps:$4 sm:$0xff]   ;;  %v1164_v5 = vld [vmem:[#allocation4 + $0x80] ss:$8 sps:$4 sm:$0xff]   ;;  %v1167_v6 = vld [vmem:[#allocation4 + $0x194] ss:$8 sps:$4 sm:$0xff]  }
  0x40   :  { %654 = vmatpush1.bf16.msra.mxu0 %v1104_v28  ;;  %v1165_v7 = vld [vmem:[#allocation4 + $0x190] ss:$8 sps:$4 sm:$0xff]   ;;  %v1170_v8 = vld [vmem:[#allocation4 + $0x184] ss:$8 sps:$4 sm:$0xff]   ;;  %v1168_v9 = vld [vmem:[#allocation4 + $0x180] ss:$8 sps:$4 sm:$0xff]  }
  0x41   :  { %655 = vmatprep.subr.bf16.mxu0 %v1105_v30  ;;  %v1171_v10 = vld [vmem:[#allocation6 + $0x78] sm:$0xff]   ;;  %v1319_v12 = vshrl.u32 %v80_v11, 7  ;;  %v78_v15 = vld [vmem:[%s1347_s2] sm:$0xf] }
  0x42   :  { %691 = vmatpush1.bf16.msra.mxu1 %v1095_v24 }
  0x43   :  { %692 = vmatprep.subr.bf16.mxu1 %v1103_v27  ;;  %v86_v13 = vsub.s32 1, %v1319_v12  ;;  %v82_v14 = vsub.s32 0, %v1319_v12  ;;  %v94_v23 = vsub.s32 3, %v1319_v12  ;;  %v90_v26 = vsub.s32 2, %v1319_v12 }
  0x44   :  { %656 = vmatpush1.bf16.msra.mxu0 %v1110_v33 }
  0x45   :  { %657 = vmatprep.subr.bf16.mxu0 %v1111_v34  ;;  %v87_v17 = vrot.slane %v78_v15, %v86_v13  ;;  %v83_v18 = vrot.slane %v78_v15, %v82_v14  ;;  %v91_v34 = vrot.slane %v78_v15, %v90_v26 }
  0x46   :  { %693 = vmatpush1.bf16.msra.mxu1 %v1101_v29 }
  0x47   :  { %694 = vmatprep.subr.bf16.mxu1 %v1109_v31 }
  0x48   :  { %658 = vmatpush1.bf16.msra.mxu0 %v1116_v36 }
  0x49   :  { %659 = vmatprep.subr.bf16.mxu0 %v1117_v38 }
  0x4a   :  { %695 = vmatpush1.bf16.msra.mxu1 %v1107_v32  ;;  %v95_v32 = vrot.slane %v78_v15, %v94_v23 }
  0x4b   :  { %696 = vmatprep.subr.bf16.mxu1 %v1115_v35 }
  0x4c   :  { %660 = vmatpush2.bf16.msra.mxu0 %v1122_v41 }
  0x4d   :  { %661 = vmatprep.subr.bf16.mxu0 %v1123_v42 }
  0x4e   :  { %697 = vmatpush1.bf16.msra.mxu1 %v1113_v37  ;;  %v1172_v37 = vld [vmem:[#allocation6 + $0x38] sm:$0xff]  }
  0x4f   :  { %698 = vmatprep.subr.bf16.mxu1 %v1121_v39 }
  0x50   :  { %662 = vmatpush2.bf16.msra.mxu0 %v1128_v44 }
  0x51   :  { %663 = vmatprep.subr.bf16.mxu0 %v1129_v46  ;;  %v1174_v46 = vld [vmem:[#allocation6 + $0x30] sm:$0xff]  }
  0x52   :  { %699 = vmatpush1.bf16.msra.mxu1 %v1119_v40  ;;  %v1173_v40 = vld [vmem:[#allocation6 + $0x70] sm:$0xff]  }
  0x53   :  { %700 = vmatprep.subr.bf16.mxu1 %v1127_v43 }
  0x54   :  { %664 = vmatpush2.bf16.msra.mxu0 %v1134_v48  ;;  %v1175_v48 = vld [vmem:[#allocation6 + $0x68] sm:$0xff]  }
  0x55   :  { %665 = vmatprep.subr.bf16.mxu0 %v1135_v50 }
  0x56   :  { %701 = vmatpush1.bf16.msra.mxu1 %v1125_v45 }
  0x57   :  { %702 = vmatprep.subr.bf16.mxu1 %v1133_v47 }
  0x58   :  { %666 = vmatpush2.bf16.msra.mxu0 %v1140_v52 }
  0x59   :  { %667 = vmatprep.subr.bf16.mxu0 %v1141_v54 }
  0x5a   :  { %703 = vmatpush2.bf16.msra.mxu1 %v1131_v49 }
  0x5b   :  { %704 = vmatprep.subr.bf16.mxu1 %v1139_v51 }
  0x5c   :  { %668 = vmatpush2.bf16.msra.mxu0 %v1146_v56  ;;  %v1178_v56 = vld [vmem:[#allocation6 + $0x20] sm:$0xff]  }
  0x5d   :  { %669 = vmatprep.subr.bf16.mxu0 %v1147_v58  ;;  %v1180_v58 = vld [vmem:[#allocation6 + $0x18] sm:$0xff]  }
  0x5e   :  { %705 = vmatpush2.bf16.msra.mxu1 %v1137_v53  ;;  %v1176_v53 = vld [vmem:[#allocation6 + $0x28] sm:$0xff]  }
  0x5f   :  { %706 = vmatprep.subr.bf16.mxu1 %v1145_v55  ;;  %v1177_v55 = vld [vmem:[#allocation6 + $0x60] sm:$0xff]  }
  0x60   :  { %670 = vmatpush2.bf16.msra.mxu0 %v1152_v61  ;;  %v1183_v61 = vld [vmem:[#allocation6 + $0x48] sm:$0xff]  }
  0x61   :  { %671 = vmatprep.subr.bf16.mxu0 %v1153_v62  ;;  %v1184_v62 = vld [vmem:[#allocation6 + $0x8] sm:$0xff]  }
  0x62   :  { %707 = vmatpush2.bf16.msra.mxu1 %v1143_v57  ;;  %v1179_v57 = vld [vmem:[#allocation6 + $0x58] sm:$0xff]  }
  0x63   :  { %708 = vmatprep.subr.bf16.mxu1 %v1151_v59  ;;  %v1181_v59 = vld [vmem:[#allocation6 + $0x50] sm:$0xff]  }
  0x64   :  { %672 = vmatpush2.bf16.msra.mxu0 %v1158_v1 }
  0x65   :  { %673 = vmatprep.subr.bf16.mxu0 %v1159_v2 }
  0x66   :  { %709 = vmatpush2.bf16.msra.mxu1 %v1149_v60  ;;  %v1182_v60 = vld [vmem:[#allocation6 + $0x10] sm:$0xff]  }
  0x67   :  { %710 = vmatprep.subr.bf16.mxu1 %v1157_v63  ;;  %v1185_v63 = vld [vmem:[#allocation6 + $0x40] sm:$0xff]  }
  0x68   :  { %674 = vmatpush2.bf16.msra.mxu0 %v1164_v5 }
  0x69   :  { %1030 = vmatprep.subr.bf16.mxu0 %v1171_v10 }
  0x6a   :  { %711 = vmatpush2.bf16.msra.mxu1 %v1155_v0  ;;  %v1186_v0 = vld [vmem:[#allocation6] sm:$0xff]  }
  0x6b   :  { %712 = vmatprep.subr.bf16.mxu1 %v1163_v3  ;;  %v311_v3 = vld [vmem:[%s1349_s4] sm:$0x3] }
  0x6c   :  { %v320_v5 = vrot.slane %v311_v3, %v86_v13 }
  0x6e   :  { %713 = vmatpush2.bf16.msra.mxu1 %v1161_v4 }
  0x6f   :  { %714 = vmatprep.subr.bf16.mxu1 %v1167_v6  ;;  %v316_v6 = vrot.slane %v311_v3, %v82_v14 }
  0x72   :  { %715 = vmatpush2.bf16.msra.mxu1 %v1165_v7 }
  0x73   :  { %716 = vmatprep.subr.bf16.mxu1 %v1170_v8 }
  0x76   :  { %717 = vmatpush2.bf16.msra.mxu1 %v1168_v9 }
  0xf1   :  { %v183_v16 = vpop.f32.mrf.mxu1 }
  0xf2   :  { %v184_v24 = vadd.f32 %v183_v16, %v83_v18 }
  0xf3   :  { %v185_v19 = vpop.f32.mrf.mxu1 }
  0xf4   :  { %v186_v21 = vadd.f32 %v185_v19, %v87_v17  ;;  %v235_v33 = vmax.f32 %v184_v24, 0.0 }
  0xf5   :  { %v187_v20 = vpop.f32.mrf.mxu1 }
  0xf6   :  { %v188_v22 = vadd.f32 %v187_v20, %v83_v18  ;;  %v236_v30 = vmax.f32 %v186_v21, 0.0 }
  0xf7   :  { %v189_v25 = vpop.f32.mrf.mxu1 }
  0xf8   :  { %v190_v27 = vadd.f32 %v189_v25, %v87_v17  ;;  %v239_v28 = vmax.f32 %v188_v22, 0.0 }
  0xf9   :  { %v226_v29 = vpop.f32.mrf.mxu1 }
  0xfa   :  { %v240_v31 = vmax.f32 %v190_v27, 0.0  ;;  %v243_v38 = vpack.c.bf16 %v239_v28, %v235_v33  ;;  %v227_v43 = vadd.f32 %v226_v29, %v91_v34  ;;  %v1004_v28 = vld [vmem:[%s1351_s6] ss:$0 sm:$0xff] }
  0xfb   :  { %v228_v35 = vpop.f32.mrf.mxu1 }
  0xfc   :  { %v244_v36 = vpack.c.bf16 %v240_v31, %v236_v30  ;;  %v229_v41 = vadd.f32 %v228_v35, %v95_v32  ;;  %v237_v51 = vmax.f32 %v227_v43, 0.0 }
  0xfd   :  { %v230_v39 = vpop.f32.mrf.mxu1 }
  0xfe   :  { %v231_v42 = vadd.f32 %v230_v39, %v91_v34  ;;  %675 = vmatprep.mubr.bf16.mxu0 %v244_v36  ;;  %v238_v49 = vmax.f32 %v229_v41, 0.0 }
  0xff   :  { %v232_v44 = vpop.f32.mrf.mxu1  ;;  %676 = vmatmul.mubr.bf16.vlgmr.msra.gmra.mxu0 %v243_v38 }
 0x100   :  { %v233_v45 = vadd.f32 %v232_v44, %v95_v32  ;;  %1031 = vmatpush3.bf16.msra.mxu0 %v1172_v37  ;;  %v241_v47 = vmax.f32 %v231_v42, 0.0 }
 0x101   :  { %1032 = vmatprep.subr.bf16.mxu0 %v1173_v40 }
 0x102   :  { %v242_v50 = vmax.f32 %v233_v45, 0.0  ;;  %v245_v54 = vpack.c.bf16 %v241_v47, %v237_v51 }
 0x104   :  { %v246_v52 = vpack.c.bf16 %v242_v50, %v238_v49  ;;  %1033 = vmatpush3.bf16.msra.mxu0 %v1174_v46 }
 0x105   :  { %1034 = vmatprep.subr.bf16.mxu0 %v1175_v48 }
 0x106   :  { %718 = vmatprep.mubr.bf16.mxu1 %v246_v52 }
 0x107   :  { %719 = vmatmul.mubr.bf16.vlgmr.msra.gmra.mxu1 %v245_v54 }
 0x108   :  { %1035 = vmatpush3.bf16.msra.mxu0 %v1176_v53 }
 0x109   :  { %1036 = vmatprep.subr.bf16.mxu0 %v1177_v55 }
 0x10c   :  { %1037 = vmatpush3.bf16.msra.mxu0 %v1178_v56 }
 0x10d   :  { %1038 = vmatprep.subr.bf16.mxu0 %v1179_v57 }
 0x110   :  { %1039 = vmatpush3.bf16.msra.mxu0 %v1180_v58 }
 0x111   :  { %1040 = vmatprep.subr.bf16.mxu0 %v1181_v59 }
 0x114   :  { %1041 = vmatpush3.bf16.msra.mxu0 %v1182_v60 }
 0x115   :  { %1042 = vmatprep.subr.bf16.mxu0 %v1183_v61 }
 0x118   :  { %1043 = vmatpush3.bf16.msra.mxu0 %v1184_v62 }
 0x119   :  { %1044 = vmatprep.subr.bf16.mxu0 %v1185_v63 }
 0x11c   :  { %1045 = vmatpush3.bf16.msra.mxu0 %v1186_v0 }
 0x1bf   :  { %v677_v1 = vpop.f32.mrf.mxu0 }
 0x1c0   :  { %v678_v15 = vadd.f32 %v677_v1, %v316_v6 }
 0x1c1   :  { %v679_v2 = vpop.f32.mrf.mxu0 }
 0x1c2   :  { %v680_v10 = vadd.f32 %v679_v2, %v320_v5 }
 0x1c3   :  { %v681_v4 = vpop.f32.mrf.mxu0 }
 0x1c4   :  { %v682_v11 = vadd.f32 %v681_v4, %v316_v6 }
 0x1c5   :  { %v683_v8 = vpop.f32.mrf.mxu0 }
 0x1c6   :  { %v684_v17 = vadd.f32 %v683_v8, %v320_v5 }
 0x1c7   :  { %v720_v7 = vpop.f32.mrf.mxu1 }
 0x1c8   :  { %v721_v20 = vadd.f32 %v720_v7, %v678_v15 }
 0x1c9   :  { %v722_v9 = vpop.f32.mrf.mxu1 }
 0x1ca   :  { %v723_v18 = vadd.f32 %v722_v9, %v680_v10  ;;  %v729_v13 = vmax.f32 %v721_v20, 0.0 }
 0x1cb   :  { %v724_v16 = vpop.f32.mrf.mxu1 }
 0x1cc   :  { %v725_v19 = vadd.f32 %v724_v16, %v682_v11  ;;  %v730_v24 = vmax.f32 %v723_v18, 0.0 }
 0x1cd   :  { %v726_v21 = vpop.f32.mrf.mxu1 }
 0x1ce   :  { %v727_v22 = vadd.f32 %v726_v21, %v684_v17  ;;  %v731_v23 = vmax.f32 %v725_v19, 0.0 }
 0x1d0   :  { %v732_v25 = vmax.f32 %v727_v22, 0.0  ;;  %v733_v12 = vpack.c.bf16 %v731_v23, %v729_v13 }
 0x1d2   :  { %v734_v26 = vpack.c.bf16 %v732_v25, %v730_v24 }
 0x1d4   :  { %902 = vmatprep.mubr.bf16.mxu0 %v734_v26 }
 0x1d5   :  { %903 = vmatmul.mubr.bf16.vlgmr.msra.gmra.mxu0 %v733_v12 }
 0x295   :  { %v1046_v14 = vpop.f32.mrf.mxu0 }
 0x297   :  { %v1047_v27 = vpop.f32.mrf.mxu0 }
 0x298   :  { %v1048_v29 = vadd.f32 %v1047_v27, %v1046_v14 }
 0x299   :  { %v1049_v30 = vpop.f32.mrf.mxu0 }
 0x29a   :  { %v905_v31 = vadd.f32 %v1048_v29, %v1004_v28 }
 0x29b   :  { %v1050_v32 = vpop.f32.mrf.mxu0 }
 0x29c   :  { %v1051_v33 = vadd.f32 %v1050_v32, %v1049_v30  ;;  %1187 = vtanh.f32 %v905_v31 }
 0x29e   :  { %v908_v34 = vadd.f32 %v1051_v33, %v1004_v28 }
 0x2a0   :  { %1189 = vtanh.f32 %v908_v34 }
 0x2a9   :  { %v1188_v35 = vpop.eup %1187 }
 0x2ad   :  { %v1190_v36 = vpop.eup %1189 }
 0x2ae   :  { %v1028_v37 = vpack.c.bf16 %v1190_v36, %v1188_v35 }
 0x2b0   :  { %1029 = vst [vmem:[%s1352_s7] sm:$0xff] %v1028_v37  }
 0x2b1   :  { %927 = vsyncpa [#allocation3], 1 }
 0x2b2   :  { %928 = vsyncpa [#allocation5], 1 }

</bundles_post_ra>
